<compile_context>
chip_gen: v7x
topology: tpu7x:2x2x1
jax: 0.10.0
libtpu: 0.0.40
codegen_flags: <defaults>
</compile_context>

<pallas_src>
import functools
import math

import jax
import jax.numpy as jnp
from jax.experimental import pallas as pl
from jax.experimental.pallas import tpu as pltpu

GATE_CHANNELS = 32
REDUCTION_RATIO = 2

TARGET_TILE_BYTES = 6 << 20   # ~6 MiB streamed blocks (>=~90% of HBM roofline)
VMEM_LIMIT_BYTES = 48 << 20   # <= v7x's 64 MiB physical VMEM; conservative on v5e/v6e


def _pick_tile_h(H, row_bytes, target_bytes=TARGET_TILE_BYTES):
    """Rows per block: multiple of 8, ~target_bytes, never a full-H runaway block.
    May return a non-divisor of H (cdiv grid + masked tail in pass 1)."""
    if H <= 8:
        return H
    rows = max(8, int(target_bytes) // max(int(row_bytes), 1))
    rows -= rows % 8
    rows = max(8, rows)
    if rows >= H:
        return H                       # one block covering full H (always a legal block dim)
    # Prefer an exact divisor (no padded tail) if it doesn't shrink the block too much.
    d = rows
    while d > 8 and H % d != 0:
        d -= 8
    if H % d == 0 and 2 * d >= rows:
        return d
    return rows


# --------------------------------------------------------------------------
# Shared in-kernel math
# --------------------------------------------------------------------------
def _tile_lanes(v, reps):
    """Repeat a (B, C) array `reps` times along the lane axis -> (B, reps*C)."""
    if reps == 1:
        return v
    return jnp.concatenate([v] * reps, axis=-1)


def _fold_w(psum, W):
    """(B, W*C) -> (B, C) by summing the W lane groups (static slices, one-shot)."""
    C = psum.shape[-1] // W
    pooled = psum[:, 0:C]
    for w in range(1, W):
        pooled = pooled + psum[:, w * C:(w + 1) * C]
    return pooled


def _gauss_scale_lanes(pooled, w1, b1, w2, b2, W):
    """MLP -> mean/std -> GaussProjection; returns scale lane-tiled to (B, W*C) f32."""
    h = jnp.dot(pooled, w1, preferred_element_type=jnp.float32) + b1
    h = jnp.maximum(h, 0.0)
    att = jnp.dot(h, w2, preferred_element_type=jnp.float32) + b2      # (B, C)
    Bn, C = att.shape
    n = float(Bn * C)
    mean = jnp.sum(att) * (1.0 / n)
    diff = att - mean
    # Unbiased variance (torch.std default).  NOTE: B*C == 1 divides by zero and
    # std == 0 yields inf/nan -- both exactly match the PyTorch module.
    var = jnp.sum(diff * diff) * (1.0 / (n - 1.0))
    std = jnp.sqrt(var)
    sigma = math.sqrt(2.0 * math.pi) * std
    scale = jnp.exp(-(diff * diff) / (2.0 * var)) / sigma              # (B, C) f32
    return _tile_lanes(scale, W)                                       # (B, W*C) f32


# --------------------------------------------------------------------------
# Fast path: single no-grid kernel, x resident in VMEM (read x from HBM once).
# --------------------------------------------------------------------------
def _fused_kernel(x_ref, w1_ref, b1_ref, w2_ref, b2_ref, o_ref, *, W, inv_hw):
    x = x_ref[...]                                       # (B, H, W*C), x.dtype
    psum = jnp.sum(x, axis=1, dtype=jnp.float32)         # accumulate in f32
    pooled = _fold_w(psum, W) * inv_hw                   # (B, C) global average
    scale_wc = _gauss_scale_lanes(pooled, w1_ref[...], b1_ref[...],
                                  w2_ref[...], b2_ref[...], W)         # (B, W*C) f32
    # Multiply in f32 (scale stays f32), cast once on the way out.
    o_ref[...] = (x * scale_wc[:, None, :]).astype(o_ref.dtype)


# --------------------------------------------------------------------------
# Streamed pass 1: pooled sum.  Parallel over B (megacore-shardable on v7x),
# reduction over H tiles; padded tail blocks are masked in-kernel.
# --------------------------------------------------------------------------
def _pool_sum_kernel(x_ref, psum_ref, *, tile_h, valid_h, need_mask):
    @pl.when(pl.program_id(1) == 0)
    def _():
        psum_ref[...] = jnp.zeros_like(psum_ref)

    x = x_ref[...]                                       # (1, tile_h, W*C)
    if need_mask:
        row = (pl.program_id(1) * tile_h
               + jax.lax.broadcasted_iota(jnp.int32, x.shape, 1))
        x = jnp.where(row < valid_h, x, jnp.zeros_like(x))
    # Accumulate in f32 without materializing a full upcast copy of the tile.
    psum_ref[...] += jnp.sum(x, axis=1, keepdims=True, dtype=jnp.float32)


# --------------------------------------------------------------------------
# Streamed pass 2: tiny no-grid epilogue (fold W, average, MLP, stats, Gaussian),
# writes the scale already lane-tiled to a dense (B, W*C) f32 slab.
# --------------------------------------------------------------------------
def _epilogue_kernel(psum_ref, w1_ref, b1_ref, w2_ref, b2_ref, scale_ref, *, W, inv_hw):
    pooled = _fold_w(psum_ref[...], W) * inv_hw          # (B, C)
    scale_ref[...] = _gauss_scale_lanes(pooled, w1_ref[...], b1_ref[...],
                                        w2_ref[...], b2_ref[...], W)


# --------------------------------------------------------------------------
# Streamed pass 3: fully parallel elementwise apply on lane-dense tiles.
# --------------------------------------------------------------------------
def _apply_kernel(x_ref, s_ref, o_ref):
    # (1, tile_h, WC) * (1, 1, WC) in f32, cast once; partial tail blocks are
    # handled by Pallas' masked writeback of the output block.
    o_ref[...] = (x_ref[...] * s_ref[...]).astype(o_ref.dtype)


def channel_gate(x, w1, b1, w2, b2, *, force_streamed=False, tile_h=None):
    """x: (B, H, W, C) with C == gate_channels. Returns same shape/dtype."""
    B, H, W, C = x.shape
    WC = W * C
    itemsize = jnp.dtype(x.dtype).itemsize
    inv_hw = 1.0 / float(H * W)

    # Lane-dense flattening: last dim W*C.  For C=32 this is a multiple of 128
    # whenever W % 4 == 0; otherwise stores fall back to masked vst (still
    # correct, just slower).  TODO(synk): pad the lane dim for awkward W.
    x2 = x.reshape(B, H, WC)

    # ---- fast path: x (+ f32 temporaries + output) fits comfortably in VMEM ----
    f32_bytes = B * H * WC * 4
    if not force_streamed and 5 * f32_bytes + (2 << 20) <= VMEM_LIMIT_BYTES:
        out2 = pl.pallas_call(
            functools.partial(_fused_kernel, W=W, inv_hw=inv_hw),
            out_shape=jax.ShapeDtypeStruct((B, H, WC), x.dtype),
            in_specs=[pl.BlockSpec(memory_space=pltpu.MemorySpace.VMEM)] * 5,
            out_specs=pl.BlockSpec(memory_space=pltpu.MemorySpace.VMEM),
            compiler_params=pltpu.CompilerParams(vmem_limit_bytes=VMEM_LIMIT_BYTES),
        )(x2, w1, b1, w2, b2)
        return out2.reshape(B, H, W, C)

    # ---- streamed path ----
    th = tile_h if tile_h is not None else _pick_tile_h(H, row_bytes=WC * itemsize)
    n_h = pl.cdiv(H, th)
    need_mask = (H % th) != 0

    # pass 1: pooled sum, parallel over B (both v7x TCs stream), reduction over H
    psum = pl.pallas_call(
        functools.partial(_pool_sum_kernel, tile_h=th, valid_h=H, need_mask=need_mask),
        out_shape=jax.ShapeDtypeStruct((B, 1, WC), jnp.float32),
        grid=(B, n_h),
        in_specs=[pl.BlockSpec((1, th, WC), lambda b, h: (b, h, 0))],
        out_specs=pl.BlockSpec((1, 1, WC), lambda b, h: (b, 0, 0)),
        compiler_params=pltpu.CompilerParams(
            dimension_semantics=("parallel", "arbitrary"),
            vmem_limit_bytes=VMEM_LIMIT_BYTES),
    )(x2)

    # pass 2: one-shot epilogue -> (B, W*C) f32 scale slab (already lane-tiled)
    scale_wc = pl.pallas_call(
        functools.partial(_epilogue_kernel, W=W, inv_hw=inv_hw),
        out_shape=jax.ShapeDtypeStruct((B, WC), jnp.float32),
        in_specs=[pl.BlockSpec(memory_space=pltpu.MemorySpace.VMEM)] * 5,
        out_specs=pl.BlockSpec(memory_space=pltpu.MemorySpace.VMEM),
    )(psum.reshape(B, WC), w1, b1, w2, b2)

    # pass 3: streamed scale-apply (mem-bound; both grid axes parallel).
    # TODO(synk): on v7x optionally sweep pipeline_mode=pl.Buffered(3) on the x
    # input and set input_output_aliases={0: 0} if x is dead after this op.
    out2 = pl.pallas_call(
        _apply_kernel,
        out_shape=jax.ShapeDtypeStruct((B, H, WC), x.dtype),
        grid=(B, n_h),
        in_specs=[pl.BlockSpec((1, th, WC), lambda b, h: (b, h, 0)),
                  pl.BlockSpec((1, 1, WC), lambda b, h: (b, 0, 0))],
        out_specs=pl.BlockSpec((1, th, WC), lambda b, h: (b, h, 0)),
        compiler_params=pltpu.CompilerParams(
            dimension_semantics=("parallel", "parallel"),
            vmem_limit_bytes=VMEM_LIMIT_BYTES),
    )(x2, scale_wc.reshape(B, 1, WC))

    return out2.reshape(B, H, W, C)


def init_params(key, gate_channels=GATE_CHANNELS, reduction_ratio=REDUCTION_RATIO):
    """Deterministic synthetic parameters (nn.Linear shapes, stored as (in, out))."""
    hidden = gate_channels // reduction_ratio
    k1, k2, k3, k4 = jax.random.split(key, 4)
    lim1 = 1.0 / math.sqrt(gate_channels)
    lim2 = 1.0 / math.sqrt(hidden)
    w1 = jax.random.uniform(k1, (gate_channels, hidden), jnp.float32, -lim1, lim1)
    b1 = jax.random.uniform(k2, (1, hidden), jnp.float32, -lim1, lim1)
    w2 = jax.random.uniform(k3, (hidden, gate_channels), jnp.float32, -lim2, lim2)
    b2 = jax.random.uniform(k4, (1, gate_channels), jnp.float32, -lim2, lim2)
    return w1, b1, w2, b2


def channel_gate_ref(x, w1, b1, w2, b2):
    """Pure-JAX reference mirroring the PyTorch forward."""
    xf = x.astype(jnp.float32)
    pooled = jnp.mean(xf, axis=(1, 2))                       # (B, C)
    h = jnp.maximum(pooled @ w1 + b1, 0.0)
    att = h @ w2 + b2                                        # (B, C)
    mean = jnp.mean(att)
    std = jnp.std(att, ddof=1)
    sigma = math.sqrt(2.0 * math.pi) * std
    scale = jnp.exp(-((att - mean) ** 2) / (2.0 * std ** 2)) / sigma
    return (xf * scale[:, None, None, :]).astype(x.dtype)


if __name__ == "__main__":
    key = jax.random.PRNGKey(0)
    kx, kx2, kp = jax.random.split(key, 3)
    w1, b1, w2, b2 = init_params(kp)

    # Small shape -> exercises the fused single-kernel fast path.
    B, H, W, C = 2, 8, 8, GATE_CHANNELS
    x = jax.random.normal(kx, (B, H, W, C), dtype=jnp.float32)
    out_fast = jax.block_until_ready(channel_gate(x, w1, b1, w2, b2))
    ref = channel_gate_ref(x, w1, b1, w2, b2)
    assert out_fast.shape == x.shape and out_fast.dtype == x.dtype
    assert jnp.allclose(out_fast, ref, atol=1e-5, rtol=1e-5)

    # Same input through the streamed (multi-pass) path.
    out_str = jax.block_until_ready(channel_gate(x, w1, b1, w2, b2, force_streamed=True))
    assert jnp.allclose(out_str, ref, atol=1e-5, rtol=1e-5)

    # Awkward H (not a multiple of the tile) -> exercises cdiv grid + masked tail.
    x3 = jax.random.normal(kx2, (2, 20, 8, C), dtype=jnp.float32)
    out3 = jax.block_until_ready(
        channel_gate(x3, w1, b1, w2, b2, force_streamed=True, tile_h=8))
    ref3 = channel_gate_ref(x3, w1, b1, w2, b2)
    assert jnp.allclose(out3, ref3, atol=1e-5, rtol=1e-5)

    print("KERNEL_OK")
</pallas_src>

<mosaic_0001>
module attributes {stable_mosaic.version = 11 : i64} {
  func.func @_fused_kernel(%arg0: memref<2x8x256xf32, #tpu.memory_space<vmem>>, %arg1: memref<32x16xf32, #tpu.memory_space<vmem>>, %arg2: memref<1x16xf32, #tpu.memory_space<vmem>>, %arg3: memref<16x32xf32, #tpu.memory_space<vmem>>, %arg4: memref<1x32xf32, #tpu.memory_space<vmem>>, %arg5: memref<2x8x256xf32, #tpu.memory_space<vmem>>) attributes {dimension_semantics = [], scalar_prefetch = 0 : i64, scratch_operands = 0 : i64, tpu.core_type = #tpu.core_type<tc>} {
    %c0 = arith.constant 0 : index
    %c0_0 = arith.constant 0 : index
    %c0_1 = arith.constant 0 : index
    %0 = vector.load %arg0[%c0, %c0_0, %c0_1] : memref<2x8x256xf32, #tpu.memory_space<vmem>>, vector<2x8x256xf32>
    %cst = arith.constant dense<0.000000e+00> : vector<2x256xf32>
    %1 = vector.multi_reduction <add>, %0, %cst [1] : vector<2x8x256xf32> to vector<2x256xf32>
    %2 = vector.extract_strided_slice %1 {offsets = [0, 0], sizes = [2, 32], strides = [1, 1]} : vector<2x256xf32> to vector<2x32xf32>
    %3 = vector.extract_strided_slice %1 {offsets = [0, 32], sizes = [2, 32], strides = [1, 1]} : vector<2x256xf32> to vector<2x32xf32>
    %4 = arith.addf %2, %3 : vector<2x32xf32>
    %5 = vector.extract_strided_slice %1 {offsets = [0, 64], sizes = [2, 32], strides = [1, 1]} : vector<2x256xf32> to vector<2x32xf32>
    %6 = arith.addf %4, %5 : vector<2x32xf32>
    %7 = vector.extract_strided_slice %1 {offsets = [0, 96], sizes = [2, 32], strides = [1, 1]} : vector<2x256xf32> to vector<2x32xf32>
    %8 = arith.addf %6, %7 : vector<2x32xf32>
    %9 = vector.extract_strided_slice %1 {offsets = [0, 128], sizes = [2, 32], strides = [1, 1]} : vector<2x256xf32> to vector<2x32xf32>
    %10 = arith.addf %8, %9 : vector<2x32xf32>
    %11 = vector.extract_strided_slice %1 {offsets = [0, 160], sizes = [2, 32], strides = [1, 1]} : vector<2x256xf32> to vector<2x32xf32>
    %12 = arith.addf %10, %11 : vector<2x32xf32>
    %13 = vector.extract_strided_slice %1 {offsets = [0, 192], sizes = [2, 32], strides = [1, 1]} : vector<2x256xf32> to vector<2x32xf32>
    %14 = arith.addf %12, %13 : vector<2x32xf32>
    %15 = vector.extract_strided_slice %1 {offsets = [0, 224], sizes = [2, 32], strides = [1, 1]} : vector<2x256xf32> to vector<2x32xf32>
    %16 = arith.addf %14, %15 : vector<2x32xf32>
    %cst_2 = arith.constant 1.562500e-02 : f32
    %17 = vector.broadcast %cst_2 : f32 to vector<2x32xf32>
    %18 = arith.mulf %16, %17 : vector<2x32xf32>
    %c0_3 = arith.constant 0 : index
    %c0_4 = arith.constant 0 : index
    %19 = vector.load %arg1[%c0_3, %c0_4] : memref<32x16xf32, #tpu.memory_space<vmem>>, vector<32x16xf32>
    %c0_5 = arith.constant 0 : index
    %c0_6 = arith.constant 0 : index
    %20 = vector.load %arg2[%c0_5, %c0_6] : memref<1x16xf32, #tpu.memory_space<vmem>>, vector<1x16xf32>
    %c0_7 = arith.constant 0 : index
    %c0_8 = arith.constant 0 : index
    %21 = vector.load %arg3[%c0_7, %c0_8] : memref<16x32xf32, #tpu.memory_space<vmem>>, vector<16x32xf32>
    %c0_9 = arith.constant 0 : index
    %c0_10 = arith.constant 0 : index
    %22 = vector.load %arg4[%c0_9, %c0_10] : memref<1x32xf32, #tpu.memory_space<vmem>>, vector<1x32xf32>
    %cst_11 = arith.constant dense<0.000000e+00> : vector<2x16xf32>
    %23 = tpu.matmul %18, %19, %cst_11 {dimension_numbers = #tpu.dot_dimension_numbers<[1], [0], [0], [1], [0, 0, 1, 1], [], []>} : vector<2x32xf32>, vector<32x16xf32>, vector<2x16xf32> -> vector<2x16xf32>
    %24 = vector.broadcast %20 : vector<1x16xf32> to vector<2x16xf32>
    %25 = arith.addf %23, %24 : vector<2x16xf32>
    %cst_12 = arith.constant 0.000000e+00 : f32
    %26 = vector.broadcast %cst_12 : f32 to vector<2x16xf32>
    %27 = arith.maximumf %25, %26 : vector<2x16xf32>
    %cst_13 = arith.constant dense<0.000000e+00> : vector<2x32xf32>
    %28 = tpu.matmul %27, %21, %cst_13 {dimension_numbers = #tpu.dot_dimension_numbers<[1], [0], [0], [1], [0, 0, 1, 1], [], []>} : vector<2x16xf32>, vector<16x32xf32>, vector<2x32xf32> -> vector<2x32xf32>
    %29 = vector.broadcast %22 : vector<1x32xf32> to vector<2x32xf32>
    %30 = arith.addf %28, %29 : vector<2x32xf32>
    %31 = vector.shape_cast %30 : vector<2x32xf32> to vector<1x2x32xf32>
    %cst_14 = arith.constant dense<0.000000e+00> : vector<1xf32>
    %32 = vector.multi_reduction <add>, %31, %cst_14 [1, 2] : vector<1x2x32xf32> to vector<1xf32>
    %33 = vector.shape_cast %32 : vector<1xf32> to vector<1x1x1xf32>
    %34 = vector.extract %33[0, 0, 0] : f32 from vector<1x1x1xf32>
    %cst_15 = arith.constant 1.562500e-02 : f32
    %35 = arith.mulf %34, %cst_15 : f32
    %36 = vector.broadcast %35 : f32 to vector<2x32xf32>
    %37 = arith.subf %30, %36 : vector<2x32xf32>
    %38 = arith.mulf %37, %37 : vector<2x32xf32>
    %39 = vector.shape_cast %38 : vector<2x32xf32> to vector<1x2x32xf32>
    %cst_16 = arith.constant dense<0.000000e+00> : vector<1xf32>
    %40 = vector.multi_reduction <add>, %39, %cst_16 [1, 2] : vector<1x2x32xf32> to vector<1xf32>
    %41 = vector.shape_cast %40 : vector<1xf32> to vector<1x1x1xf32>
    %42 = vector.extract %41[0, 0, 0] : f32 from vector<1x1x1xf32>
    %cst_17 = arith.constant 0.0158730168 : f32
    %43 = arith.mulf %42, %cst_17 : f32
    %44 = math.sqrt %43 : f32
    %cst_18 = arith.constant 2.50662827 : f32
    %45 = arith.mulf %cst_18, %44 : f32
    %46 = arith.mulf %37, %37 : vector<2x32xf32>
    %cst_19 = arith.constant 0.000000e+00 : f32
    %47 = vector.broadcast %cst_19 : f32 to vector<2x32xf32>
    %48 = arith.subf %47, %46 : vector<2x32xf32>
    %cst_20 = arith.constant 2.000000e+00 : f32
    %49 = arith.mulf %cst_20, %43 : f32
    %50 = vector.broadcast %49 : f32 to vector<2x32xf32>
    %51 = arith.divf %48, %50 : vector<2x32xf32>
    %52 = math.exp %51 : vector<2x32xf32>
    %53 = vector.broadcast %45 : f32 to vector<2x32xf32>
    %54 = arith.divf %52, %53 : vector<2x32xf32>
    %55 = tpu.concatenate %54, %54, %54, %54, %54, %54, %54, %54 in 1 : vector<2x32xf32>, vector<2x32xf32>, vector<2x32xf32>, vector<2x32xf32>, vector<2x32xf32>, vector<2x32xf32>, vector<2x32xf32>, vector<2x32xf32> -> vector<2x256xf32>
    %56 = vector.shape_cast %55 : vector<2x256xf32> to vector<2x1x256xf32>
    %57 = vector.broadcast %56 : vector<2x1x256xf32> to vector<2x8x256xf32>
    %58 = arith.mulf %0, %57 : vector<2x8x256xf32>
    %c0_21 = arith.constant 0 : index
    %c0_22 = arith.constant 0 : index
    %c0_23 = arith.constant 0 : index
    %59 = vector.load %arg5[%c0_21, %c0_22, %c0_23] : memref<2x8x256xf32, #tpu.memory_space<vmem>>, vector<2x8x256xf32>
    tpu.vector_store %arg5[%c0_21, %c0_22, %c0_23], %58 {strides = array<i32>} : memref<2x8x256xf32, #tpu.memory_space<vmem>>, vector<2x8x256xf32>,
    return
  }
}

</mosaic_0001>

<bundles_post_ra>
// kernel: tpu_custom_call.1
= control target key start
LH: loop header
LB: loop body
LE: loop exit
PB: predicated region body
PF: predicated region fallthrough
CT: control target
= control target key end

     0   :  { %s621_s0 = inlined_call_operand.vmem [shape: f32[2,8,256], index: 0, kind: input, shape index: {}]   ;;  %s622_s1 = inlined_call_operand.vmem [shape: f32[32,16], index: 1, kind: input, shape index: {}]   ;;  %s623_s2 = inlined_call_operand.vmem [shape: f32[1,16], index: 2, kind: input, shape index: {}]   ;;  %s624_s3 = inlined_call_operand.vmem [shape: f32[16,32], index: 3, kind: input, shape index: {}]   ;;  %s625_s4 = inlined_call_operand.vmem [shape: f32[1,32], index: 4, kind: input, shape index: {}]   ;;  %s626_s5 = inlined_call_operand.hbm [shape: f32[2,8,256], index: 5, kind: output, shape index: {}]  }
   0x1   :  { %v537_v0 = vld [vmem:[%s621_s0 + $0x10] sm:$0xff]  ;;  %v542_v1 = vld [vmem:[%s621_s0] sm:$0xff]  ;;  %v547_v2 = vld [vmem:[%s621_s0 + $0x8] sm:$0xff] }
   0x2   :  { %v37_v3 = vrot.slane %v537_v0, 4  ;;  %v25_v4 = vrot.slane %v542_v1, 4  ;;  %v31_v5 = vrot.slane %v547_v2, 4  ;;  %v555_v6 = vld [vmem:[%s621_s0 + $0x18] sm:$0xff] }
   0x3   :  { %v43_v7 = vrot.slane %v555_v6, 4 }
   0x4   :  { %10 = vsyncpa [#allocation3], 0  ;;  %v38_v8 = vadd.f32 %v37_v3, %v537_v0  ;;  %v26_v9 = vadd.f32 %v25_v4, %v542_v1  ;;  %v32_v12 = vadd.f32 %v31_v5, %v547_v2  ;;  %s494_s0 = smov 64   ;;  %s495_s26 = smov 96   ;;  %v105_v26 = vld [vmem:[%s622_s1] sm:$0xff]  ;;  %v106_v27 = vld [vmem:[%s622_s1 + $0x8] sm:$0xff] }
   0x5   :  { %v44_v13 = vadd.f32 %v43_v7, %v555_v6  ;;  %v496_v28 = vmov 0.0|0.0   ;;  %v438_v29 = vpack.c.bf16 %v106_v27, %v105_v26  ;;  %s497_s6 = smov 32   ;;  %v107_v32 = vld [vmem:[%s622_s1 + $0x10] sm:$0xff]  ;;  %v108_v33 = vld [vmem:[%s622_s1 + $0x18] sm:$0xff]  ;;  %vm498_vm0 = vmmov 0   ;;  %v110_v5 = vld [vmem:[%s624_s3] sm:$0xff] }
   0x6   :  { %v39_v10 = vrot.slane %v38_v8, 2  ;;  %v27_v11 = vrot.slane %v26_v9, 2  ;;  %v33_v18 = vrot.slane %v32_v12, 2  ;;  %437 = vmatprep.subr.bf16.mxu0 %v496_v28  ;;  %443 = vmatprep.subr.bf16.mxu1 %v496_v28  ;;  %v441_v34 = vpack.c.bf16 %v108_v33, %v107_v32  ;;  %v111_v7 = vld [vmem:[%s624_s3 + $0x8] sm:$0xff]  ;;  %s501_s22 = smov [#allocation2]  }
   0x7   :  { %v45_v19 = vrot.slane %v44_v13, 2  ;;  %439 = vmatpush3.bf16.msra.mxu0 %v438_v29  ;;  %v499_v35 = vmov 0.0   ;;  %vm122_vm1 = vcmask 1041409   ;;  %vm124_vm2 = vcmask 261120   ;;  %s396_s23 = sshll.u32 %s501_s22, 4  ;;  %s397_s23 = int_to_ptr.vmem [resolvable:$true] %s396_s23 }
   0x8   :  { %v40_v14 = vadd.f32 %v39_v10, %v38_v8  ;;  %v28_v15 = vadd.f32 %v27_v11, %v26_v9  ;;  %v34_v22 = vadd.f32 %v33_v18, %v32_v12  ;;  %440 = vmatprep.subr.bf16.mxu0 %v496_v28  ;;  %427 = vmatprep.mubr.msk.f32.mxu0 %vm498_vm0, %v499_v35  ;;  %v407_v9 = vld [vmem:[%s623_s2] ss:$0 sm:$0xff]  ;;  %vm204_vm3 = vcmask 130048   ;;  %s470_s24 = scalar_lea.vmem %s397_s23, 512  ;;  %p475_p1 = scmp.lt.s32.totalorder %s397_s23, %s397_s23 }
   0x9   :  { %v46_v23 = vadd.f32 %v45_v19, %v44_v13  ;;  %434 = vmatprep.mubr.msk.f32.mxu1 %vm498_vm0, %v499_v35  ;;  %v444_v8 = vpack.c.bf16 %v111_v7, %v110_v5  ;;  %vm278_vm4 = vcmask 254976   ;;  %vm335_vm7 = vcmask 523264   ;;  %p471_p0 = scmp.ne.s32.totalorder %s397_s23, %s470_s24  ;;  %p476_p2 = scmp.lt.s32.totalorder %s470_s24, %s470_s24 }
   0xa   :  { %v41_v16 = vrot.slane %v40_v14, 1  ;;  %v29_v17 = vrot.slane %v28_v15, 1  ;;  %v35_v24 = vrot.slane %v34_v22, 1  ;;  %vm337_vm8 = vcmask 785408  }
   0xb   :  { %v47_v25 = vrot.slane %v46_v23, 1  ;;  %442 = vmatpush3.bf16.msra.mxu0 %v441_v34  ;;  %445 = vmatpush3.bf16.msra.mxu1 %v444_v8  ;;  %p477_p3 = por %p476_p2, %p475_p1 }
   0xc   :  { %v42_v20 = vadd.f32 %v41_v16, %v40_v14  ;;  %v30_v21 = vadd.f32 %v29_v17, %v28_v15  ;;  %v36_v30 = vadd.f32 %v35_v24, %v34_v22  ;;  %v409_v14 = vld [vmem:[%s625_s4] ss:$0 sm:$0xff] }
   0xd   :  { %v48_v31 = vadd.f32 %v47_v25, %v46_v23  ;;  %p478_p4 = pnand %p477_p3, %p471_p0 }
   0xe   :  { %61 = vrot.lane.b32.xlu1 %v42_v20, %s494_s0  ;;  %53 = vrot.lane.b32.xlu0 %v42_v20, %s495_s26 }
  0x12   :  { %59 = vrot.lane.b32.xlu1 %v30_v21, %s494_s0  ;;  %51 = vrot.lane.b32.xlu0 %v30_v21, %s495_s26 }
  0x16   :  { %67 = vrot.lane.b32.xlu1 %v30_v21, %s497_s6  ;;  %69 = vrot.lane.b32.xlu0 %v42_v20, %s497_s6 }
  0x1a   :  { %79 = vrot.lane.b32.xlu1 %v36_v30, %s495_s26  ;;  %81 = vrot.lane.b32.xlu0 %v48_v31, %s495_s26 }
  0x1e   :  { %87 = vrot.lane.b32.xlu1 %v36_v30, %s494_s0  ;;  %89 = vrot.lane.b32.xlu0 %v48_v31, %s494_s0 }
  0x22   :  { %95 = vrot.lane.b32.xlu1 %v36_v30, %s497_s6  ;;  %97 = vrot.lane.b32.xlu0 %v48_v31, %s497_s6 }
  0x80   :  { %v62_v36 = vpop.permute.xlu1 %61  ;;  %v54_v37 = vpop.permute.xlu0 %53 }
  0x81   :  { %v58_v38 = vadd.f32 %v54_v37, %v42_v20 }
  0x83   :  { %v66_v43 = vadd.f32 %v62_v36, %v58_v38 }
  0x84   :  { %v60_v39 = vpop.permute.xlu1 %59  ;;  %v52_v40 = vpop.permute.xlu0 %51 }
  0x85   :  { %v57_v41 = vadd.f32 %v52_v40, %v30_v21 }
  0x87   :  { %v65_v42 = vadd.f32 %v60_v39, %v57_v41 }
  0x88   :  { %v68_v44 = vpop.permute.xlu1 %67  ;;  %v70_v45 = vpop.permute.xlu0 %69 }
  0x89   :  { %v73_v46 = vadd.f32 %v68_v44, %v65_v42  ;;  %v74_v47 = vadd.f32 %v70_v45, %v66_v43 }
  0x8b   :  { %v75_v50 = vadd.f32 %v73_v46, %v36_v30  ;;  %v76_v51 = vadd.f32 %v74_v47, %v48_v31 }
  0x8c   :  { %v80_v48 = vpop.permute.xlu1 %79  ;;  %v82_v49 = vpop.permute.xlu0 %81 }
  0x8d   :  { %v85_v54 = vadd.f32 %v80_v48, %v75_v50  ;;  %v86_v55 = vadd.f32 %v82_v49, %v76_v51 }
  0x90   :  { %v88_v52 = vpop.permute.xlu1 %87  ;;  %v90_v53 = vpop.permute.xlu0 %89 }
  0x91   :  { %v93_v56 = vadd.f32 %v88_v52, %v85_v54  ;;  %v94_v57 = vadd.f32 %v90_v53, %v86_v55  ;;  %v500_v52 = vmov 1966171168   ;;  %v344_v54 = vlaneseq }
  0x92   :  { %v342_v53 = vunpack.c.l.s4 %v500_v52 }
  0x94   :  { %v96_v58 = vpop.permute.xlu1 %95  ;;  %v98_v59 = vpop.permute.xlu0 %97 }
  0x95   :  { %v101_v60 = vadd.f32 %v96_v58, %v93_v56  ;;  %v102_v61 = vadd.f32 %v98_v59, %v94_v57  ;;  %v343_v56 = vunpack.c.0.s8 %v342_v53  ;;  %v345_v57 = vshrl.u32 %v344_v54, 7 }
  0x97   :  { %v104_v62 = vmul.f32 0.015625, %v102_v61  ;;  %v103_v63 = vmul.f32 0.015625, %v101_v60  ;;  %v346_v61 = vsub.s32 %v343_v56, %v345_v57  ;;  %v369_v5 = vsub.s32 1, %v345_v57 }
  0x99   :  { %v121_v3 = vrot.slane %v104_v62, 7 }
  0x9b   :  { %v123_v4 = vsel %vm122_vm1, %v121_v3, %v103_v63 }
  0x9c   :  { %428 = vmatmul.mubr.msk.f32.vlgmr.msra.gmra.mrb[0].mxu0 %vm124_vm2, %v123_v4  ;;  %v365_v4 = vsub.s32 0, %v345_v57 }
 0x16f   :  { %v193_v10 = vpop.f32.mrb[0].mxu0 }
 0x170   :  { %v194_v11 = vadd.f32 %v407_v9, %v193_v10  ;;  %v429_v12 = vpop.f32.mrb[1].mxu0 }
 0x172   :  { %v197_v13 = vmax.f32 %v194_v11, 0.0 }
 0x174   :  { %435 = vmatmul.mubr.msk.f32.vlgmr.msra.gmra.mrb[0].mxu1 %vm204_vm3, %v197_v13 }
 0x247   :  { %v274_v15 = vpop.f32.mrb[0].mxu1 }
 0x248   :  { %v275_v16 = vadd.f32 %v409_v14, %v274_v15  ;;  %v436_v17 = vpop.f32.mrb[1].mxu1 }
 0x24a   :  { %v279_v18 = vsel %vm278_vm4, %v275_v16, 0.0 }
 0x24b   :  { %280 = vadd.xlane.f32.xlu0 %v279_v18 }
 0x2d8   :  { %v281_v19 = vpop.xlane.xlu0 %280 }
 0x2d9   :  { %v282_v20 = vrot.slane %v281_v19, 4 }
 0x2db   :  { %v283_v21 = vadd.f32 %v282_v20, %v281_v19 }
 0x2dd   :  { %v284_v22 = vrot.slane %v283_v21, 2 }
 0x2df   :  { %v285_v23 = vadd.f32 %v284_v22, %v283_v21 }
 0x2e1   :  { %v286_v24 = vrot.slane %v285_v23, 1 }
 0x2e3   :  { %v287_v25 = vadd.f32 %v286_v24, %v285_v23 }
 0x2e5   :  { %446 = vpush %v287_v25 }
 0x316   :  { %s447_s2 = spop %446 }
 0x317   :  { %s289_s3 = smul.f32 0.015625, %s447_s2 }
 0x319   :  { %v290_v26 = vstv %s289_s3 }
 0x31a   :  { %v291_v27 = vsub.f32 %v275_v16, %v290_v26 }
 0x31c   :  { %v292_v28 = vmul.f32 %v291_v27, %v291_v27 }
 0x31e   :  { %v293_v29 = vsel %vm278_vm4, %v292_v28, 0.0  ;;  %v314_v45 = vsub.f32 0.0, %v292_v28 }
 0x31f   :  { %294 = vadd.xlane.f32.xlu1 %v293_v29 }
 0x3ac   :  { %v295_v30 = vpop.xlane.xlu1 %294 }
 0x3ad   :  { %v296_v31 = vrot.slane %v295_v30, 4 }
 0x3af   :  { %v297_v32 = vadd.f32 %v296_v31, %v295_v30 }
 0x3b1   :  { %v298_v33 = vrot.slane %v297_v32, 2 }
 0x3b3   :  { %v299_v34 = vadd.f32 %v298_v33, %v297_v32 }
 0x3b5   :  { %v300_v35 = vrot.slane %v299_v34, 1 }
 0x3b7   :  { %v301_v36 = vadd.f32 %v300_v35, %v299_v34 }
 0x3b9   :  { %448 = vpush %v301_v36 }
 0x3ea   :  { %s449_s4 = spop %448 }
 0x3eb   :  { %s303_s18 = smul.f32 0.015873017, %s449_s4 }
 0x3ed   :  { %v304_v37 = vstv %s303_s18  ;;  %s315_s19 = smul.f32 2.0, %s303_s18 }
 0x3ee   :  { %462 = vrsqrt.f32 %v304_v37  ;;  %vm307_vm5 = vcmp.eq.f32.partialorder %v304_v37, inf  ;;  %v310_v40 = vand.u32 2147483648, %v304_v37  ;;  %vm309_vm6 = vcmp.eq.f32.partialorder %v304_v37, 0.0 }
 0x3ef   :  { %v316_v43 = vstv %s315_s19 }
 0x3f0   :  { %464 = vrcp.f32 %v316_v43 }
 0x3f8   :  { %v463_v38 = vpop.eup %462 }
 0x3f9   :  { %v306_v39 = vmul.f32 %v463_v38, %v304_v37 }
 0x3fa   :  { %v465_v44 = vpop.eup %464 }
 0x3fb   :  { %v308_v41 = vsel %vm307_vm5, %v304_v37, %v306_v39  ;;  %v318_v46 = vmul.f32 %v465_v44, %v314_v45 }
 0x3fc   :  { %v311_v42 = vsel %vm309_vm6, %v310_v40, %v308_v41 }
 0x3fd   :  { %450 = vpush %v311_v42  ;;  %v319_v47 = vmul.f32 1.442695, %v318_v46 }
 0x3ff   :  { %466 = vpow2.f32 %v319_v47 }
 0x409   :  { %v467_v49 = vpop.eup %466 }
 0x42e   :  { %s451_s20 = spop %450 }
 0x42f   :  { %s313_s21 = smul.f32 2.5066283, %s451_s20 }
 0x431   :  { %v321_v48 = vstv %s313_s21 }
 0x432   :  { %468 = vrcp.f32 %v321_v48 }
 0x43c   :  { %v469_v50 = vpop.eup %468 }
 0x43d   :  { %v323_v51 = vmul.f32 %v469_v50, %v467_v49 }
 0x43f   :  { %328 = vrot.lane.b32.xlu1 %v323_v51, %s494_s0  ;;  %325 = vrot.lane.b32.xlu0 %v323_v51, %s497_s6 }
 0x443   :  { %331 = vrot.lane.b32.xlu0 %v323_v51, %s495_s26 }
 0x4b1   :  { %v326_v55 = vpop.permute.xlu0 %325  ;;  %v329_v58 = vpop.permute.xlu1 %328 }
 0x4b2   :  { %v334_v59 = vsel %vm124_vm2, %v323_v51, %v326_v55 }
 0x4b3   :  { %v336_v60 = vsel %vm335_vm7, %v334_v59, %v329_v58 }
 0x4b5   :  { %v332_v62 = vpop.permute.xlu0 %331 }
 0x4b6   :  { %v338_v63 = vsel %vm337_vm8, %v336_v60, %v332_v62 }
 0x4b7   :  { %v340_v3 = vcombine.low %v338_v63, %v338_v63 }
 0x4b9   :  { %v347_v7 = vrot.slane %v340_v3, %v346_v61 }
 0x4bb   :  { %v348_v8 = vcombine.high %v347_v7, %v347_v7  ;;  %v355_v9 = vrot.slane %v347_v7, %v346_v61 }
 0x4bd   :  { %v362_v10 = vrot.slane %v348_v8, %v346_v61  ;;  %v366_v11 = vrot.slane %v355_v9, %v365_v4  ;;  %v370_v12 = vrot.slane %v355_v9, %v369_v5 }
 0x4bf   :  { %v374_v13 = vrot.slane %v362_v10, %v365_v4  ;;  %v378_v14 = vrot.slane %v362_v10, %v369_v5  ;;  %v383_v15 = vmul.f32 %v366_v11, %v542_v1  ;;  %v384_v16 = vmul.f32 %v370_v12, %v547_v2 }
 0x4c1   :  { %v385_v17 = vmul.f32 %v374_v13, %v537_v0  ;;  %v386_v18 = vmul.f32 %v378_v14, %v555_v6  ;;  %387 = vst [vmem:[#allocation2] sm:$0xff] %v383_v15  ;;  %388 = vst [vmem:[#allocation2 + $0x8] sm:$0xff] %v384_v16 }
 0x4c3   :  { %389 = vst [vmem:[#allocation2 + $0x10] sm:$0xff] %v385_v17  ;;  %390 = vst [vmem:[#allocation2 + $0x18] sm:$0xff] %v386_v18 }
 0x4c4   :  { %481 = shalt.err (!%p478_p4)
}
 0x4c5   :  { %s482_s26 = scalar_lea.hbm %s626_s5, 512 }
 0x4c6   :  { %p483_p5 = scmp.ne.s32.totalorder %s626_s5, %s482_s26  ;;  %p486_p6 = scmp.lt.u32.totalorder %s482_s26, %s626_s5 }
 0x4c8   :  { %p488_p7 = pnand %p486_p6, %p483_p5 }
 0x4ca   :  { %491 = shalt.err (!%p488_p7)
}
 0x4cb   :  { %s502_s6 = smov 256   ;;  %s503_s7 = smov 16  }
 0x4cc   :  { %402 = dma.vmem_to_hbm [thread:$0]  %s397_s23, 512, %s626_s5, [#allocation3], %s502_s6, %s502_s6, %s503_s7  }
 0x4cd   :  { %492 = dma.done.wait [#allocation3], 512  }
 0x4ce   :  { %493 = vsyncadd [#allocation3], 4294966784 }
 0x4cf   :  { %406 = vsyncpa [#allocation3], 1 }

</bundles_post_ra>
